<compile_context>
chip_gen: v7x
topology: tpu7x:2x2x1
jax: 0.10.0
libtpu: 0.0.40
codegen_flags: <defaults>
</compile_context>

<pallas_src>
import functools

import jax
import jax.numpy as jnp
from jax.experimental import pallas as pl
from jax.experimental.pallas import tpu as pltpu

N_HIDDEN = 20
N_LAYERS = 7  # number of Linear(20, 20) layers in the ParameterList


def _round_up(v, m):
    return ((v + m - 1) // m) * m


def _mlp_kernel(x_ref, t_ref, wx_ref, wt_ref, b_in_ref,
                w_h_ref, b_h_ref, w_out_ref, b_out_ref, out_ref):
    """Feature-major MLP block kernel.

    x_ref    : (1, TN)         f32   collocation x values (lane axis = points)
    t_ref    : (1, TN)         f32   collocation t values
    wx_ref   : (20, 1)         f32   input-layer weight column for x
    wt_ref   : (20, 1)         f32   input-layer weight column for t
    b_in_ref : (20, 1)         f32
    w_h_ref  : (7, 20, 20)     f32   hidden weights, (out, in) convention
    b_h_ref  : (7, 20, 1)      f32
    w_out_ref: (1, 20)         f32
    b_out_ref: (1, 1)          f32
    out_ref  : (1, TN)         f32
    """
    x = x_ref[...]                                               # (1, TN)
    t = t_ref[...]                                               # (1, TN)

    # Input layer Linear(2, 20) + tanh as two broadcast FMAs (VPU, no MXU pass).
    h = jnp.tanh(wx_ref[...] * x + wt_ref[...] * t + b_in_ref[...])   # (20, TN)

    # 7 hidden layers: (20,20) @ (20,TN) + bias, tanh.  Static unroll.
    for i in range(N_LAYERS):
        h = jnp.tanh(
            jnp.dot(w_h_ref[i], h, preferred_element_type=jnp.float32)
            + b_h_ref[i]
        )                                                        # (20, TN)

    # Output layer Linear(20, 1), no activation -> lane-dense (1, TN) store.
    out_ref[...] = (
        jnp.dot(w_out_ref[...], h, preferred_element_type=jnp.float32)
        + b_out_ref[...]
    )


@jax.jit
def u_forward(x, t, params):
    """Reproduces U.forward(x, t); returns (N, 1) float32."""
    x = jnp.atleast_1d(x).astype(jnp.float32)
    t = jnp.atleast_1d(t).astype(jnp.float32)
    n = x.shape[0]

    # Tile size along the point axis: multiple of 128, capped at 1024.
    tn = min(1024, _round_up(max(n, 1), 128))
    n_pad = _round_up(n, tn)
    grid_n = n_pad // tn

    x_row = jnp.pad(x, (0, n_pad - n)).reshape(1, n_pad)
    t_row = jnp.pad(t, (0, n_pad - n)).reshape(1, n_pad)

    (w_in_x, w_in_t, b_in, w_h, b_h, w_out, b_out) = params

    # Activations / output: blocked along the lane (point) axis.
    act_spec = pl.BlockSpec((1, tn), lambda i: (0, i))
    # Weights / biases: full arrays, resident across the whole grid.
    const2 = lambda shape: pl.BlockSpec(shape, lambda i: (0, 0))
    const3 = lambda shape: pl.BlockSpec(shape, lambda i: (0, 0, 0))

    n_params = 2 * N_HIDDEN + N_HIDDEN + N_LAYERS * (N_HIDDEN * N_HIDDEN + N_HIDDEN) + N_HIDDEN + 1
    cost = pl.CostEstimate(
        flops=n_pad * (2 * 2 * N_HIDDEN
                       + N_LAYERS * 2 * N_HIDDEN * N_HIDDEN
                       + 2 * N_HIDDEN),
        transcendentals=n_pad * (N_LAYERS + 1) * N_HIDDEN,
        bytes_accessed=4 * (3 * n_pad + n_params),
    )

    out_row = pl.pallas_call(
        _mlp_kernel,
        out_shape=jax.ShapeDtypeStruct((1, n_pad), jnp.float32),
        grid=(grid_n,),
        in_specs=[
            act_spec,                                   # x
            act_spec,                                   # t
            const2((N_HIDDEN, 1)),                      # w_in_x
            const2((N_HIDDEN, 1)),                      # w_in_t
            const2((N_HIDDEN, 1)),                      # b_in
            const3((N_LAYERS, N_HIDDEN, N_HIDDEN)),     # w_h
            const3((N_LAYERS, N_HIDDEN, 1)),            # b_h
            const2((1, N_HIDDEN)),                      # w_out
            const2((1, 1)),                             # b_out
        ],
        out_specs=act_spec,
        compiler_params=pltpu.CompilerParams(
            dimension_semantics=("parallel",),
            vmem_limit_bytes=32 * 1024 * 1024,
        ),
        cost_estimate=cost,
    )(x_row, t_row, w_in_x, w_in_t, b_in, w_h, b_h, w_out, b_out)

    return out_row[0, :n].reshape(n, 1)


def init_params(key):
    """Deterministic synthetic params matching U.__init__ shapes.

    PyTorch-Linear-style uniform(-1/sqrt(fan_in), +1/sqrt(fan_in)) init, stored
    in the feature-major (out_features, in_features) convention used by the
    kernel (same as torch's native weight layout).
    """
    keys = jax.random.split(key, 2 + 2 * N_LAYERS + 2)
    ki = iter(range(len(keys)))

    def lin(kw, kb, fan_in, fan_out):
        bound = 1.0 / jnp.sqrt(jnp.float32(fan_in))
        w = jax.random.uniform(kw, (fan_out, fan_in), jnp.float32,
                               minval=-bound, maxval=bound)
        b = jax.random.uniform(kb, (fan_out, 1), jnp.float32,
                               minval=-bound, maxval=bound)
        return w, b

    w_in, b_in = lin(keys[next(ki)], keys[next(ki)], 2, N_HIDDEN)   # (20,2),(20,1)
    w_in_x = w_in[:, 0:1]                                           # (20, 1)
    w_in_t = w_in[:, 1:2]                                           # (20, 1)

    w_h_list, b_h_list = [], []
    for _ in range(N_LAYERS):
        w, b = lin(keys[next(ki)], keys[next(ki)], N_HIDDEN, N_HIDDEN)
        w_h_list.append(w)
        b_h_list.append(b)
    w_h = jnp.stack(w_h_list, axis=0)                # (7, 20, 20)
    b_h = jnp.stack(b_h_list, axis=0)                # (7, 20, 1)

    w_out, b_out = lin(keys[next(ki)], keys[next(ki)], N_HIDDEN, 1)  # (1,20),(1,1)

    return (w_in_x, w_in_t, b_in, w_h, b_h, w_out, b_out)


def _reference_forward(x, t, params):
    """Pure-JAX reference of U.forward (row-major) for a correctness check."""
    x = jnp.atleast_1d(x).astype(jnp.float32)
    t = jnp.atleast_1d(t).astype(jnp.float32)
    w_in_x, w_in_t, b_in, w_h, b_h, w_out, b_out = params
    inp = jnp.stack((x, t), axis=1)                               # (N, 2)
    w_in = jnp.concatenate([w_in_x, w_in_t], axis=1)              # (20, 2)
    h = jnp.tanh(inp @ w_in.T + b_in[:, 0])                       # (N, 20)
    for i in range(N_LAYERS):
        h = jnp.tanh(h @ w_h[i].T + b_h[i, :, 0])
    return h @ w_out.T + b_out[:, 0]                              # (N, 1)


if __name__ == "__main__":
    key = jax.random.PRNGKey(0)

    # Inputs consistent with the original script:
    #   x = linspace(-1, 1, 100), t = zeros(100)
    N = 100
    x = jnp.linspace(-1.0, 1.0, N, dtype=jnp.float32)
    t = jnp.zeros((N,), dtype=jnp.float32)

    params = init_params(key)

    out = u_forward(x, t, params)
    out = jax.block_until_ready(out)

    assert out.shape == (N, 1), out.shape
    assert out.dtype == jnp.float32, out.dtype

    ref = _reference_forward(x, t, params)
    assert jnp.allclose(out, ref, atol=1e-5, rtol=1e-5), (
        float(jnp.max(jnp.abs(out - ref)))
    )

    print("KERNEL_OK")
</pallas_src>

<mosaic_0001>
module attributes {stable_mosaic.version = 11 : i64} {
  func.func @_mlp_kernel(%arg0: i32, %arg1: memref<1x128xf32, #tpu.memory_space<vmem>>, %arg2: memref<1x128xf32, #tpu.memory_space<vmem>>, %arg3: memref<20x1xf32, #tpu.memory_space<vmem>>, %arg4: memref<20x1xf32, #tpu.memory_space<vmem>>, %arg5: memref<20x1xf32, #tpu.memory_space<vmem>>, %arg6: memref<7x20x20xf32, #tpu.memory_space<vmem>>, %arg7: memref<7x20x1xf32, #tpu.memory_space<vmem>>, %arg8: memref<1x20xf32, #tpu.memory_space<vmem>>, %arg9: memref<1x1xf32, #tpu.memory_space<vmem>>, %arg10: memref<1x128xf32, #tpu.memory_space<vmem>>) attributes {dimension_semantics = [#tpu.dimension_semantics<parallel>], iteration_bounds = array<i64: 1>, scalar_prefetch = 0 : i64, scratch_operands = 0 : i64, tpu.core_type = #tpu.core_type<tc>, window_params = [{transform_indices = @transform_0, window_bounds = array<i64: 1, 128>}, {transform_indices = @transform_1, window_bounds = array<i64: 1, 128>}, {pipeline_mode = #tpu.pipeline_mode<synchronous>, transform_indices = @transform_2, window_bounds = array<i64: 20, 1>}, {pipeline_mode = #tpu.pipeline_mode<synchronous>, transform_indices = @transform_3, window_bounds = array<i64: 20, 1>}, {pipeline_mode = #tpu.pipeline_mode<synchronous>, transform_indices = @transform_4, window_bounds = array<i64: 20, 1>}, {pipeline_mode = #tpu.pipeline_mode<synchronous>, transform_indices = @transform_5, window_bounds = array<i64: 7, 20, 20>}, {pipeline_mode = #tpu.pipeline_mode<synchronous>, transform_indices = @transform_6, window_bounds = array<i64: 7, 20, 1>}, {pipeline_mode = #tpu.pipeline_mode<synchronous>, transform_indices = @transform_7, window_bounds = array<i64: 1, 20>}, {pipeline_mode = #tpu.pipeline_mode<synchronous>, transform_indices = @transform_8, window_bounds = array<i64: 1, 1>}, {transform_indices = @transform_9, window_bounds = array<i64: 1, 128>}]} {
    %c0 = arith.constant 0 : index
    %c0_0 = arith.constant 0 : index
    %0 = vector.load %arg1[%c0, %c0_0] : memref<1x128xf32, #tpu.memory_space<vmem>>, vector<1x128xf32>
    %c0_1 = arith.constant 0 : index
    %c0_2 = arith.constant 0 : index
    %1 = vector.load %arg2[%c0_1, %c0_2] : memref<1x128xf32, #tpu.memory_space<vmem>>, vector<1x128xf32>
    %c0_3 = arith.constant 0 : index
    %c0_4 = arith.constant 0 : index
    %2 = vector.load %arg3[%c0_3, %c0_4] : memref<20x1xf32, #tpu.memory_space<vmem>>, vector<20x1xf32>
    %3 = vector.broadcast %2 : vector<20x1xf32> to vector<20x128xf32>
    %4 = vector.broadcast %0 : vector<1x128xf32> to vector<20x128xf32>
    %5 = arith.mulf %3, %4 : vector<20x128xf32>
    %c0_5 = arith.constant 0 : index
    %c0_6 = arith.constant 0 : index
    %6 = vector.load %arg4[%c0_5, %c0_6] : memref<20x1xf32, #tpu.memory_space<vmem>>, vector<20x1xf32>
    %7 = vector.broadcast %6 : vector<20x1xf32> to vector<20x128xf32>
    %8 = vector.broadcast %1 : vector<1x128xf32> to vector<20x128xf32>
    %9 = arith.mulf %7, %8 : vector<20x128xf32>
    %10 = arith.addf %5, %9 : vector<20x128xf32>
    %c0_7 = arith.constant 0 : index
    %c0_8 = arith.constant 0 : index
    %11 = vector.load %arg5[%c0_7, %c0_8] : memref<20x1xf32, #tpu.memory_space<vmem>>, vector<20x1xf32>
    %12 = vector.broadcast %11 : vector<20x1xf32> to vector<20x128xf32>
    %13 = arith.addf %10, %12 : vector<20x128xf32>
    %14 = math.tanh %13 : vector<20x128xf32>
    %c0_9 = arith.constant 0 : index
    %c0_10 = arith.constant 0 : index
    %c0_11 = arith.constant 0 : index
    %15 = vector.load %arg6[%c0_9, %c0_10, %c0_11] : memref<7x20x20xf32, #tpu.memory_space<vmem>>, vector<1x20x20xf32>
    %16 = vector.shape_cast %15 : vector<1x20x20xf32> to vector<20x20xf32>
    %cst = arith.constant dense<0.000000e+00> : vector<20x128xf32>
    %17 = tpu.matmul %16, %14, %cst {dimension_numbers = #tpu.dot_dimension_numbers<[1], [0], [0], [1], [0, 0, 1, 1], [], []>} : vector<20x20xf32>, vector<20x128xf32>, vector<20x128xf32> -> vector<20x128xf32>
    %c0_12 = arith.constant 0 : index
    %c0_13 = arith.constant 0 : index
    %c0_14 = arith.constant 0 : index
    %18 = vector.load %arg7[%c0_12, %c0_13, %c0_14] : memref<7x20x1xf32, #tpu.memory_space<vmem>>, vector<1x20x1xf32>
    %19 = vector.shape_cast %18 : vector<1x20x1xf32> to vector<20x1xf32>
    %20 = vector.broadcast %19 : vector<20x1xf32> to vector<20x128xf32>
    %21 = arith.addf %17, %20 : vector<20x128xf32>
    %22 = math.tanh %21 : vector<20x128xf32>
    %c1 = arith.constant 1 : index
    %c0_15 = arith.constant 0 : index
    %c0_16 = arith.constant 0 : index
    %23 = vector.load %arg6[%c1, %c0_15, %c0_16] : memref<7x20x20xf32, #tpu.memory_space<vmem>>, vector<1x20x20xf32>
    %24 = vector.shape_cast %23 : vector<1x20x20xf32> to vector<20x20xf32>
    %cst_17 = arith.constant dense<0.000000e+00> : vector<20x128xf32>
    %25 = tpu.matmul %24, %22, %cst_17 {dimension_numbers = #tpu.dot_dimension_numbers<[1], [0], [0], [1], [0, 0, 1, 1], [], []>} : vector<20x20xf32>, vector<20x128xf32>, vector<20x128xf32> -> vector<20x128xf32>
    %c1_18 = arith.constant 1 : index
    %c0_19 = arith.constant 0 : index
    %c0_20 = arith.constant 0 : index
    %26 = vector.load %arg7[%c1_18, %c0_19, %c0_20] : memref<7x20x1xf32, #tpu.memory_space<vmem>>, vector<1x20x1xf32>
    %27 = vector.shape_cast %26 : vector<1x20x1xf32> to vector<20x1xf32>
    %28 = vector.broadcast %27 : vector<20x1xf32> to vector<20x128xf32>
    %29 = arith.addf %25, %28 : vector<20x128xf32>
    %30 = math.tanh %29 : vector<20x128xf32>
    %c2 = arith.constant 2 : index
    %c0_21 = arith.constant 0 : index
    %c0_22 = arith.constant 0 : index
    %31 = vector.load %arg6[%c2, %c0_21, %c0_22] : memref<7x20x20xf32, #tpu.memory_space<vmem>>, vector<1x20x20xf32>
    %32 = vector.shape_cast %31 : vector<1x20x20xf32> to vector<20x20xf32>
    %cst_23 = arith.constant dense<0.000000e+00> : vector<20x128xf32>
    %33 = tpu.matmul %32, %30, %cst_23 {dimension_numbers = #tpu.dot_dimension_numbers<[1], [0], [0], [1], [0, 0, 1, 1], [], []>} : vector<20x20xf32>, vector<20x128xf32>, vector<20x128xf32> -> vector<20x128xf32>
    %c2_24 = arith.constant 2 : index
    %c0_25 = arith.constant 0 : index
    %c0_26 = arith.constant 0 : index
    %34 = vector.load %arg7[%c2_24, %c0_25, %c0_26] : memref<7x20x1xf32, #tpu.memory_space<vmem>>, vector<1x20x1xf32>
    %35 = vector.shape_cast %34 : vector<1x20x1xf32> to vector<20x1xf32>
    %36 = vector.broadcast %35 : vector<20x1xf32> to vector<20x128xf32>
    %37 = arith.addf %33, %36 : vector<20x128xf32>
    %38 = math.tanh %37 : vector<20x128xf32>
    %c3 = arith.constant 3 : index
    %c0_27 = arith.constant 0 : index
    %c0_28 = arith.constant 0 : index
    %39 = vector.load %arg6[%c3, %c0_27, %c0_28] : memref<7x20x20xf32, #tpu.memory_space<vmem>>, vector<1x20x20xf32>
    %40 = vector.shape_cast %39 : vector<1x20x20xf32> to vector<20x20xf32>
    %cst_29 = arith.constant dense<0.000000e+00> : vector<20x128xf32>
    %41 = tpu.matmul %40, %38, %cst_29 {dimension_numbers = #tpu.dot_dimension_numbers<[1], [0], [0], [1], [0, 0, 1, 1], [], []>} : vector<20x20xf32>, vector<20x128xf32>, vector<20x128xf32> -> vector<20x128xf32>
    %c3_30 = arith.constant 3 : index
    %c0_31 = arith.constant 0 : index
    %c0_32 = arith.constant 0 : index
    %42 = vector.load %arg7[%c3_30, %c0_31, %c0_32] : memref<7x20x1xf32, #tpu.memory_space<vmem>>, vector<1x20x1xf32>
    %43 = vector.shape_cast %42 : vector<1x20x1xf32> to vector<20x1xf32>
    %44 = vector.broadcast %43 : vector<20x1xf32> to vector<20x128xf32>
    %45 = arith.addf %41, %44 : vector<20x128xf32>
    %46 = math.tanh %45 : vector<20x128xf32>
    %c4 = arith.constant 4 : index
    %c0_33 = arith.constant 0 : index
    %c0_34 = arith.constant 0 : index
    %47 = vector.load %arg6[%c4, %c0_33, %c0_34] : memref<7x20x20xf32, #tpu.memory_space<vmem>>, vector<1x20x20xf32>
    %48 = vector.shape_cast %47 : vector<1x20x20xf32> to vector<20x20xf32>
    %cst_35 = arith.constant dense<0.000000e+00> : vector<20x128xf32>
    %49 = tpu.matmul %48, %46, %cst_35 {dimension_numbers = #tpu.dot_dimension_numbers<[1], [0], [0], [1], [0, 0, 1, 1], [], []>} : vector<20x20xf32>, vector<20x128xf32>, vector<20x128xf32> -> vector<20x128xf32>
    %c4_36 = arith.constant 4 : index
    %c0_37 = arith.constant 0 : index
    %c0_38 = arith.constant 0 : index
    %50 = vector.load %arg7[%c4_36, %c0_37, %c0_38] : memref<7x20x1xf32, #tpu.memory_space<vmem>>, vector<1x20x1xf32>
    %51 = vector.shape_cast %50 : vector<1x20x1xf32> to vector<20x1xf32>
    %52 = vector.broadcast %51 : vector<20x1xf32> to vector<20x128xf32>
    %53 = arith.addf %49, %52 : vector<20x128xf32>
    %54 = math.tanh %53 : vector<20x128xf32>
    %c5 = arith.constant 5 : index
    %c0_39 = arith.constant 0 : index
    %c0_40 = arith.constant 0 : index
    %55 = vector.load %arg6[%c5, %c0_39, %c0_40] : memref<7x20x20xf32, #tpu.memory_space<vmem>>, vector<1x20x20xf32>
    %56 = vector.shape_cast %55 : vector<1x20x20xf32> to vector<20x20xf32>
    %cst_41 = arith.constant dense<0.000000e+00> : vector<20x128xf32>
    %57 = tpu.matmul %56, %54, %cst_41 {dimension_numbers = #tpu.dot_dimension_numbers<[1], [0], [0], [1], [0, 0, 1, 1], [], []>} : vector<20x20xf32>, vector<20x128xf32>, vector<20x128xf32> -> vector<20x128xf32>
    %c5_42 = arith.constant 5 : index
    %c0_43 = arith.constant 0 : index
    %c0_44 = arith.constant 0 : index
    %58 = vector.load %arg7[%c5_42, %c0_43, %c0_44] : memref<7x20x1xf32, #tpu.memory_space<vmem>>, vector<1x20x1xf32>
    %59 = vector.shape_cast %58 : vector<1x20x1xf32> to vector<20x1xf32>
    %60 = vector.broadcast %59 : vector<20x1xf32> to vector<20x128xf32>
    %61 = arith.addf %57, %60 : vector<20x128xf32>
    %62 = math.tanh %61 : vector<20x128xf32>
    %c6 = arith.constant 6 : index
    %c0_45 = arith.constant 0 : index
    %c0_46 = arith.constant 0 : index
    %63 = vector.load %arg6[%c6, %c0_45, %c0_46] : memref<7x20x20xf32, #tpu.memory_space<vmem>>, vector<1x20x20xf32>
    %64 = vector.shape_cast %63 : vector<1x20x20xf32> to vector<20x20xf32>
    %cst_47 = arith.constant dense<0.000000e+00> : vector<20x128xf32>
    %65 = tpu.matmul %64, %62, %cst_47 {dimension_numbers = #tpu.dot_dimension_numbers<[1], [0], [0], [1], [0, 0, 1, 1], [], []>} : vector<20x20xf32>, vector<20x128xf32>, vector<20x128xf32> -> vector<20x128xf32>
    %c6_48 = arith.constant 6 : index
    %c0_49 = arith.constant 0 : index
    %c0_50 = arith.constant 0 : index
    %66 = vector.load %arg7[%c6_48, %c0_49, %c0_50] : memref<7x20x1xf32, #tpu.memory_space<vmem>>, vector<1x20x1xf32>
    %67 = vector.shape_cast %66 : vector<1x20x1xf32> to vector<20x1xf32>
    %68 = vector.broadcast %67 : vector<20x1xf32> to vector<20x128xf32>
    %69 = arith.addf %65, %68 : vector<20x128xf32>
    %70 = math.tanh %69 : vector<20x128xf32>
    %c0_51 = arith.constant 0 : index
    %c0_52 = arith.constant 0 : index
    %71 = vector.load %arg8[%c0_51, %c0_52] : memref<1x20xf32, #tpu.memory_space<vmem>>, vector<1x20xf32>
    %cst_53 = arith.constant dense<0.000000e+00> : vector<1x128xf32>
    %72 = tpu.matmul %71, %70, %cst_53 {dimension_numbers = #tpu.dot_dimension_numbers<[1], [0], [0], [1], [0, 0, 1, 1], [], []>} : vector<1x20xf32>, vector<20x128xf32>, vector<1x128xf32> -> vector<1x128xf32>
    %c0_54 = arith.constant 0 : index
    %c0_55 = arith.constant 0 : index
    %73 = vector.load %arg9[%c0_54, %c0_55] : memref<1x1xf32, #tpu.memory_space<vmem>>, vector<1x1xf32>
    %74 = vector.broadcast %73 : vector<1x1xf32> to vector<1x128xf32>
    %75 = arith.addf %72, %74 : vector<1x128xf32>
    %c0_56 = arith.constant 0 : index
    %c0_57 = arith.constant 0 : index
    %76 = vector.load %arg10[%c0_56, %c0_57] : memref<1x128xf32, #tpu.memory_space<vmem>>, vector<1x128xf32>
    tpu.vector_store %arg10[%c0_56, %c0_57], %75 {strides = array<i32>} : memref<1x128xf32, #tpu.memory_space<vmem>>, vector<1x128xf32>,
    return
  }
  func.func @transform_0(%arg0: i32) -> (i32, i32) {
    %c0_i32 = arith.constant 0 : i32
    %c0_i32_0 = arith.constant 0 : i32
    return %c0_i32, %arg0 : i32, i32
  }
  func.func @transform_1(%arg0: i32) -> (i32, i32) {
    %c0_i32 = arith.constant 0 : i32
    %c0_i32_0 = arith.constant 0 : i32
    return %c0_i32, %arg0 : i32, i32
  }
  func.func @transform_2(%arg0: i32) -> (i32, i32) {
    %c0_i32 = arith.constant 0 : i32
    %c0_i32_0 = arith.constant 0 : i32
    %c0_i32_1 = arith.constant 0 : i32
    return %c0_i32, %c0_i32_0 : i32, i32
  }
  func.func @transform_3(%arg0: i32) -> (i32, i32) {
    %c0_i32 = arith.constant 0 : i32
    %c0_i32_0 = arith.constant 0 : i32
    %c0_i32_1 = arith.constant 0 : i32
    return %c0_i32, %c0_i32_0 : i32, i32
  }
  func.func @transform_4(%arg0: i32) -> (i32, i32) {
    %c0_i32 = arith.constant 0 : i32
    %c0_i32_0 = arith.constant 0 : i32
    %c0_i32_1 = arith.constant 0 : i32
    return %c0_i32, %c0_i32_0 : i32, i32
  }
  func.func @transform_5(%arg0: i32) -> (i32, i32, i32) {
    %c0_i32 = arith.constant 0 : i32
    %c0_i32_0 = arith.constant 0 : i32
    %c0_i32_1 = arith.constant 0 : i32
    %c0_i32_2 = arith.constant 0 : i32
    return %c0_i32, %c0_i32_0, %c0_i32_1 : i32, i32, i32
  }
  func.func @transform_6(%arg0: i32) -> (i32, i32, i32) {
    %c0_i32 = arith.constant 0 : i32
    %c0_i32_0 = arith.constant 0 : i32
    %c0_i32_1 = arith.constant 0 : i32
    %c0_i32_2 = arith.constant 0 : i32
    return %c0_i32, %c0_i32_0, %c0_i32_1 : i32, i32, i32
  }
  func.func @transform_7(%arg0: i32) -> (i32, i32) {
    %c0_i32 = arith.constant 0 : i32
    %c0_i32_0 = arith.constant 0 : i32
    %c0_i32_1 = arith.constant 0 : i32
    return %c0_i32, %c0_i32_0 : i32, i32
  }
  func.func @transform_8(%arg0: i32) -> (i32, i32) {
    %c0_i32 = arith.constant 0 : i32
    %c0_i32_0 = arith.constant 0 : i32
    %c0_i32_1 = arith.constant 0 : i32
    return %c0_i32, %c0_i32_0 : i32, i32
  }
  func.func @transform_9(%arg0: i32) -> (i32, i32) {
    %c0_i32 = arith.constant 0 : i32
    %c0_i32_0 = arith.constant 0 : i32
    return %c0_i32, %arg0 : i32, i32
  }
}

</mosaic_0001>

<bundles_post_ra>
// kernel: u_forward.1
= control target key start
LH: loop header
LB: loop body
LE: loop exit
PB: predicated region body
PF: predicated region fallthrough
CT: control target
= control target key end

     0   :  { %v1345_v0 = vmov 0   ;;  %v1346_v16 = vmov 0.0|0.0   ;;  %vm1347_vm0 = vmmov 0   ;;  %v1348_v21 = vmov 0.0   ;;  %s1660_s3 = inlined_call_operand.vmem [shape: f32[20,1], index: 3, kind: input, shape index: {}]   ;;  %s1661_s2 = inlined_call_operand.vmem [shape: f32[20,1], index: 2, kind: input, shape index: {}]   ;;  %s1662_s8 = inlined_call_operand.<no memory space> [shape: f32[1,1], index: 8, kind: input, shape index: {}]   ;;  %s1663_s4 = inlined_call_operand.vmem [shape: f32[20,1], index: 4, kind: input, shape index: {}]   ;;  %s1664_s6 = inlined_call_operand.vmem [shape: f32[7,20,1], index: 6, kind: input, shape index: {}]   ;;  %s1665_s1 = inlined_call_operand.vmem [shape: f32[1,128], index: 1, kind: input, shape index: {}]   ;;  %s1666_s0 = inlined_call_operand.vmem [shape: f32[1,128], index: 0, kind: input, shape index: {}]   ;;  %s1667_s5 = inlined_call_operand.vmem [shape: f32[7,20,20], index: 5, kind: input, shape index: {}]   ;;  %s1668_s7 = inlined_call_operand.vmem [shape: f32[1,20], index: 7, kind: input, shape index: {}]   ;;  %s1669_s9 = inlined_call_operand.vmem [shape: f32[1,128], index: 9, kind: output, shape index: {}]  }
   0x1   :  { %1296 = vset.pattern.permute.xlu1 %v1345_v0  ;;  %1295 = vset.pattern.permute.xlu0 %v1345_v0  ;;  %v63_v1 = vld [vmem:[%s1660_s3] sm:$0xff]  ;;  %v14_v3 = vstv %s1662_s8  ;;  %v64_v4 = vld [vmem:[%s1660_s3 + $0x8] sm:$0xff]  ;;  %v65_v8 = vld [vmem:[%s1660_s3 + $0x10] sm:$0xf]  ;;  %vm148_vm1 = vcmask 1043456   ;;  %vm138_vm2 = vcmask 162816  }
   0x2   :  { %v36_v2 = vld [vmem:[%s1661_s2] sm:$0xff]  ;;  %68 = vperm.xlu1 %1296, %v63_v1   ;;  %15 = vst [vmem:[#allocation2] sm:$0x1] %v14_v3  ;;  %v37_v5 = vld [vmem:[%s1661_s2 + $0x8] sm:$0xff]  ;;  %v38_v9 = vld [vmem:[%s1661_s2 + $0x10] sm:$0xf]  ;;  %1263 = vmatprep.subr.bf16.mxu0 %v1346_v16 }
   0x3   :  { %41 = vperm.xlu0 %1295, %v36_v2   ;;  %v94_v6 = vld [vmem:[%s1663_s4 + $0x8] sm:$0xff]  ;;  %v93_v7 = vld [vmem:[%s1663_s4] sm:$0xff]  ;;  %v95_v11 = vld [vmem:[%s1663_s4 + $0x10] sm:$0xf]  ;;  %1287 = vmatprep.subr.bf16.mxu1 %v1346_v16 }
   0x4   :  { %v120_v10 = vld [vmem:[%s1664_s6] sm:$0xff]  ;;  %v122_v12 = vld [vmem:[%s1664_s6 + $0x10] sm:$0xf]  ;;  %v121_v13 = vld [vmem:[%s1664_s6 + $0x8] sm:$0xff]  ;;  %1155 = vmatprep.mubr.msk.f32.mxu0 %vm1347_vm0, %v1348_v21  ;;  %1161 = vmatprep.mubr.msk.f32.mxu1 %vm1347_vm0, %v1348_v21 }
   0x5   :  { %v1045_v14 = vld [vmem:[%s1664_s6 + $0x20] sm:$0xff]  ;;  %v1044_v15 = vld [vmem:[%s1664_s6 + $0x18] sm:$0xff]  ;;  %v1054_v17 = vld [vmem:[%s1664_s6 + $0x30] sm:$0xff] }
   0x6   :  { %73 = vperm.xlu1 %1296, %v64_v4   ;;  %v1046_v18 = vld [vmem:[%s1664_s6 + $0x28] sm:$0xf]  ;;  %v1056_v19 = vld [vmem:[%s1664_s6 + $0x40] sm:$0xf]  ;;  %v1055_v20 = vld [vmem:[%s1664_s6 + $0x38] sm:$0xff] }
   0x7   :  { %46 = vperm.xlu0 %1295, %v37_v5   ;;  %v1065_v22 = vld [vmem:[%s1664_s6 + $0x50] sm:$0xff]  ;;  %v1064_v23 = vld [vmem:[%s1664_s6 + $0x48] sm:$0xff]  ;;  %v1074_v24 = vld [vmem:[%s1664_s6 + $0x60] sm:$0xff] }
   0x8   :  { %v1066_v25 = vld [vmem:[%s1664_s6 + $0x58] sm:$0xf]  ;;  %v1076_v26 = vld [vmem:[%s1664_s6 + $0x70] sm:$0xf]  ;;  %v1075_v27 = vld [vmem:[%s1664_s6 + $0x68] sm:$0xff] }
   0x9   :  { %v1085_v28 = vld [vmem:[%s1664_s6 + $0x80] sm:$0xff]  ;;  %v1084_v29 = vld [vmem:[%s1664_s6 + $0x78] sm:$0xff]  ;;  %v1094_v30 = vld [vmem:[%s1664_s6 + $0x90] sm:$0xff] }
   0xa   :  { %103 = vperm.xlu1 %1296, %v94_v6   ;;  %v1086_v31 = vld [vmem:[%s1664_s6 + $0x88] sm:$0xf]  ;;  %v1096_v32 = vld [vmem:[%s1664_s6 + $0xa0] sm:$0xf]  ;;  %v1095_v33 = vld [vmem:[%s1664_s6 + $0x98] sm:$0xff] }
   0xb   :  { %98 = vperm.xlu0 %1295, %v93_v7   ;;  %v944_v34 = vld [vmem:[#allocation2] sm:$0x1]  ;;  %v119_v62 = vld [vmem:[%s1667_s5 + $0x10] sm:$0xf]  ;;  %v118_v0 = vld [vmem:[%s1667_s5 + $0x8] sm:$0xff] }
   0xc   :  { %v1036_v36 = vld [vmem:[%s1665_s1] ss:$0 sm:$0xff] }
   0xd   :  { %v1035_v38 = vld [vmem:[%s1666_s0] ss:$0 sm:$0xff] }
   0xe   :  { %78 = vperm.xlu1 %1296, %v65_v8   ;;  %v117_v61 = vld [vmem:[%s1667_s5] sm:$0xff] }
   0xf   :  { %51 = vperm.xlu0 %1295, %v38_v9  }
  0x12   :  { %125 = vperm.xlu1 %1296, %v120_v10  }
  0x13   :  { %108 = vperm.xlu0 %1295, %v95_v11  }
  0x16   :  { %135 = vperm.xlu1 %1296, %v122_v12  }
  0x17   :  { %130 = vperm.xlu0 %1295, %v121_v13  }
  0x1a   :  { %250 = vperm.xlu1 %1296, %v1045_v14  }
  0x1b   :  { %245 = vperm.xlu0 %1295, %v1044_v15  }
  0x1e   :  { %363 = vperm.xlu1 %1296, %v1054_v17   ;;  %v1041_v17 = vld [vmem:[%s1667_s5 + $0x18] sm:$0xff] }
  0x1f   :  { %255 = vperm.xlu0 %1295, %v1046_v18  }
  0x22   :  { %373 = vperm.xlu1 %1296, %v1056_v19   ;;  %v1042_v19 = vld [vmem:[%s1667_s5 + $0x20] sm:$0xff] }
  0x23   :  { %368 = vperm.xlu0 %1295, %v1055_v20   ;;  %v1043_v20 = vld [vmem:[%s1667_s5 + $0x28] sm:$0xf] }
  0x26   :  { %486 = vperm.xlu1 %1296, %v1065_v22  }
  0x27   :  { %481 = vperm.xlu0 %1295, %v1064_v23  }
  0x2a   :  { %599 = vperm.xlu1 %1296, %v1074_v24  }
  0x2b   :  { %491 = vperm.xlu0 %1295, %v1066_v25  }
  0x2e   :  { %609 = vperm.xlu1 %1296, %v1076_v26  }
  0x2f   :  { %604 = vperm.xlu0 %1295, %v1075_v27  }
  0x32   :  { %722 = vperm.xlu1 %1296, %v1085_v28  }
  0x33   :  { %717 = vperm.xlu0 %1295, %v1084_v29  }
  0x36   :  { %835 = vperm.xlu1 %1296, %v1094_v30  }
  0x37   :  { %727 = vperm.xlu0 %1295, %v1086_v31  }
  0x3a   :  { %845 = vperm.xlu1 %1296, %v1096_v32  }
  0x3b   :  { %840 = vperm.xlu0 %1295, %v1095_v33  }
  0x3f   :  { %947 = vperm.xlu0 %1295, %v944_v34  }
  0x81   :  { %v69_v35 = vpop.permute.xlu1 %68 }
  0x82   :  { %v42_v37 = vpop.permute.xlu0 %41  ;;  %v87_v39 = vmul.f32 %v1036_v36, %v69_v35 }
  0x83   :  { %v60_v40 = vmul.f32 %v1035_v38, %v42_v37  ;;  %v1051_v37 = vld [vmem:[%s1667_s5 + $0x30] sm:$0xff] }
  0x85   :  { %v74_v41 = vpop.permute.xlu1 %73  ;;  %v90_v46 = vadd.f32 %v87_v39, %v60_v40  ;;  %v1052_v39 = vld [vmem:[%s1667_s5 + $0x38] sm:$0xff]  ;;  %v1053_v40 = vld [vmem:[%s1667_s5 + $0x40] sm:$0xf] }
  0x86   :  { %v47_v42 = vpop.permute.xlu0 %46  ;;  %v88_v43 = vmul.f32 %v1036_v36, %v74_v41 }
  0x87   :  { %v61_v44 = vmul.f32 %v1035_v38, %v47_v42 }
  0x89   :  { %v91_v45 = vadd.f32 %v88_v43, %v61_v44  ;;  %v104_v47 = vpop.permute.xlu1 %103 }
  0x8a   :  { %v99_v48 = vpop.permute.xlu0 %98 }
  0x8b   :  { %v112_v49 = vadd.f32 %v104_v47, %v91_v45  ;;  %v111_v50 = vadd.f32 %v99_v48, %v90_v46 }
  0x8d   :  { %1297 = vtanh.f32 %v112_v49  ;;  %v79_v51 = vpop.permute.xlu1 %78 }
  0x8e   :  { %1299 = vtanh.f32 %v111_v50  ;;  %v52_v52 = vpop.permute.xlu0 %51  ;;  %v89_v53 = vmul.f32 %v1036_v36, %v79_v51 }
  0x8f   :  { %v62_v54 = vmul.f32 %v1035_v38, %v52_v52 }
  0x91   :  { %v92_v55 = vadd.f32 %v89_v53, %v62_v54  ;;  %v126_v1 = vpop.permute.xlu1 %125 }
  0x92   :  { %v109_v56 = vpop.permute.xlu0 %108 }
  0x93   :  { %v113_v57 = vadd.f32 %v109_v56, %v92_v55  ;;  %v1061_v56 = vld [vmem:[%s1667_s5 + $0x48] sm:$0xff] }
  0x95   :  { %1301 = vtanh.f32 %v113_v57  ;;  %v136_v11 = vpop.permute.xlu1 %135 }
  0x96   :  { %v131_v7 = vpop.permute.xlu0 %130 }
  0x97   :  { %v1298_v58 = vpop.eup %1297 }
  0x98   :  { %v1300_v59 = vpop.eup %1299 }
  0x99   :  { %v1264_v60 = vpack.c.bf16 %v1298_v58, %v1300_v59  ;;  %v251_v26 = vpop.permute.xlu1 %250  ;;  %v1062_v58 = vld [vmem:[%s1667_s5 + $0x50] sm:$0xff]  ;;  %v1063_v59 = vld [vmem:[%s1667_s5 + $0x58] sm:$0xf] }
  0x9a   :  { %v246_v23 = vpop.permute.xlu0 %245 }
  0x9b   :  { %1265 = vmatpush3.bf16.msra.mxu0 %v1264_v60  ;;  %1289 = vmatpush3.bf16.msra.mxu1 %v1264_v60 }
  0x9c   :  { %1153 = vmatprep.subr.mxu0 %v1348_v21  ;;  %1288 = vmatprep.subr.mxu1 %v1348_v21 }
  0x9d   :  { %v364_v42 = vpop.permute.xlu1 %363 }
  0x9e   :  { %v256_v30 = vpop.permute.xlu0 %255 }
  0x9f   :  { %v1302_v63 = vpop.eup %1301 }
  0xa0   :  { %1154 = vmatpush3.msk.msra.mxu0 %vm148_vm1, %v1302_v63  ;;  %1290 = vmatpush3.msk.msra.mxu1 %vm148_vm1, %v1302_v63 }
  0xa1   :  { %1156 = vmatmul.mubr.msk.f32.vlgmr.msra.gmra.mrb[0].mxu0 %vm138_vm2, %v117_v61  ;;  %1162 = vmatmul.mubr.msk.f32.vlgmr.msra.gmra.mrb[0].mxu1 %vm138_vm2, %v119_v62  ;;  %v374_v49 = vpop.permute.xlu1 %373 }
  0xa2   :  { %1158 = vmatprep.mubr.msk.f32.mxu0 %vm1347_vm0, %v1348_v21  ;;  %1266 = vmatprep.subr.bf16.mxu1 %v1346_v16  ;;  %v369_v45 = vpop.permute.xlu0 %368 }
  0xa3   :  { %1170 = vmatprep.mubr.msk.f32.mxu1 %vm1347_vm0, %v1348_v21  ;;  %1269 = vmatprep.subr.bf16.mxu0 %v1346_v16 }
  0xa5   :  { %1159 = vmatmul.mubr.msk.f32.gmra.mrb[2].mxu0 %vm138_vm2, %v118_v0  ;;  %v487_v0 = vpop.permute.xlu1 %486 }
  0xa6   :  { %1185 = vmatprep.mubr.msk.f32.mxu0 %vm1347_vm0, %v1348_v21  ;;  %v482_v61 = vpop.permute.xlu0 %481 }
 0x174   :  { %v218_v2 = vpop.f32.mrb[0].mxu0  ;;  %v228_v3 = vpop.f32.mrb[0].mxu1 }
 0x175   :  { %v1157_v4 = vpop.f32.mrb[1].mxu0  ;;  %v1163_v5 = vpop.f32.mrb[1].mxu1  ;;  %v219_v6 = vadd.f32 %v218_v2, %v126_v1  ;;  %v229_v12 = vadd.f32 %v228_v3, %v136_v11  ;;  %v1071_v11 = vld [vmem:[%s1667_s5 + $0x60] sm:$0xff] }
 0x176   :  { %v492_v4 = vpop.permute.xlu0 %491 }
 0x177   :  { %1303 = vtanh.f32 %v219_v6 }
 0x178   :  { %v223_v8 = vpop.f32.mrb[2].mxu0 }
 0x179   :  { %v224_v9 = vadd.f32 %v223_v8, %v131_v7  ;;  %v1160_v10 = vpop.f32.mrb[3].mxu0 }
 0x17b   :  { %1305 = vtanh.f32 %v224_v9 }
 0x17c   :  { %1307 = vtanh.f32 %v229_v12 }
 0x181   :  { %v1304_v13 = vpop.eup %1303 }
 0x185   :  { %v1306_v14 = vpop.eup %1305 }
 0x186   :  { %v1267_v15 = vpack.c.bf16 %v1306_v14, %v1304_v13  ;;  %v1308_v18 = vpop.eup %1307  ;;  %v1072_v13 = vld [vmem:[%s1667_s5 + $0x68] sm:$0xff]  ;;  %v1073_v14 = vld [vmem:[%s1667_s5 + $0x70] sm:$0xf] }
 0x188   :  { %1268 = vmatpush3.bf16.msra.mxu1 %v1267_v15 }
 0x189   :  { %1168 = vmatprep.subr.mxu1 %v1348_v21 }
 0x18c   :  { %1169 = vmatpush3.msk.msra.mxu1 %vm148_vm1, %v1308_v18 }
 0x18d   :  { %1171 = vmatmul.mubr.msk.f32.vlgmr.msra.gmra.mrb[2].mxu1 %vm138_vm2, %v1041_v17  ;;  %1272 = vmatprep.subr.bf16.mxu1 %v1346_v16  ;;  %v600_v17 = vpop.permute.xlu1 %599 }
 0x18e   :  { %1173 = vmatprep.mubr.msk.f32.mxu1 %vm1347_vm0, %v1348_v21 }
 0x191   :  { %1174 = vmatmul.mubr.msk.f32.gmra.mrb[4].mxu1 %vm138_vm2, %v1042_v19 }
 0x192   :  { %1176 = vmatprep.mubr.msk.f32.mxu1 %vm1347_vm0, %v1348_v21 }
 0x195   :  { %1177 = vmatmul.mubr.msk.f32.gmra.mrb[6].mxu1 %vm138_vm2, %v1043_v20  ;;  %v605_v20 = vpop.permute.xlu0 %604 }
 0x196   :  { %1200 = vmatprep.mubr.msk.f32.mxu1 %vm1347_vm0, %v1348_v21 }
 0x260   :  { %v336_v22 = vpop.f32.mrb[2].mxu1 }
 0x261   :  { %v1172_v24 = vpop.f32.mrb[3].mxu1  ;;  %v337_v25 = vadd.f32 %v336_v22, %v246_v23 }
 0x263   :  { %1309 = vtanh.f32 %v337_v25  ;;  %v610_v25 = vpop.permute.xlu1 %609 }
 0x264   :  { %v341_v27 = vpop.f32.mrb[4].mxu1 }
 0x265   :  { %v342_v28 = vadd.f32 %v341_v27, %v251_v26  ;;  %v1175_v29 = vpop.f32.mrb[5].mxu1 }
 0x267   :  { %1311 = vtanh.f32 %v342_v28 }
 0x268   :  { %v346_v31 = vpop.f32.mrb[6].mxu1 }
 0x269   :  { %v347_v32 = vadd.f32 %v346_v31, %v256_v30  ;;  %v1178_v33 = vpop.f32.mrb[7].mxu1 }
 0x26b   :  { %1313 = vtanh.f32 %v347_v32  ;;  %v1081_v32 = vld [vmem:[%s1667_s5 + $0x78] sm:$0xff] }
 0x26d   :  { %v1310_v34 = vpop.eup %1309 }
 0x271   :  { %v1312_v35 = vpop.eup %1311 }
 0x272   :  { %v1270_v36 = vpack.c.bf16 %v1312_v35, %v1310_v34  ;;  %v1082_v34 = vld [vmem:[%s1667_s5 + $0x80] sm:$0xff]  ;;  %v1083_v35 = vld [vmem:[%s1667_s5 + $0x88] sm:$0xf] }
 0x274   :  { %1271 = vmatpush3.bf16.msra.mxu0 %v1270_v36  ;;  %v718_v36 = vpop.permute.xlu0 %717 }
 0x275   :  { %1183 = vmatprep.subr.mxu0 %v1348_v21  ;;  %v1314_v38 = vpop.eup %1313 }
 0x278   :  { %1184 = vmatpush3.msk.msra.mxu0 %vm148_vm1, %v1314_v38 }
 0x279   :  { %1186 = vmatmul.mubr.msk.f32.vlgmr.msra.gmra.mrb[4].mxu0 %vm138_vm2, %v1051_v37  ;;  %1275 = vmatprep.subr.bf16.mxu0 %v1346_v16 }
 0x27a   :  { %1188 = vmatprep.mubr.msk.f32.mxu0 %vm1347_vm0, %v1348_v21 }
 0x27d   :  { %1189 = vmatmul.mubr.msk.f32.gmra.mrb[6].mxu0 %vm138_vm2, %v1052_v39  ;;  %v723_v39 = vpop.permute.xlu1 %722 }
 0x27e   :  { %1191 = vmatprep.mubr.msk.f32.mxu0 %vm1347_vm0, %v1348_v21 }
 0x281   :  { %1192 = vmatmul.mubr.msk.f32.gmra.mrb[8].mxu0 %vm138_vm2, %v1053_v40 }
 0x282   :  { %1215 = vmatprep.mubr.msk.f32.mxu0 %vm1347_vm0, %v1348_v21 }
 0x34c   :  { %v454_v41 = vpop.f32.mrb[4].mxu0 }
 0x34d   :  { %v1187_v43 = vpop.f32.mrb[5].mxu0  ;;  %v455_v44 = vadd.f32 %v454_v41, %v364_v42 }
 0x34e   :  { %v728_v43 = vpop.permute.xlu0 %727 }
 0x34f   :  { %1315 = vtanh.f32 %v455_v44 }
 0x350   :  { %v459_v46 = vpop.f32.mrb[6].mxu0 }
 0x351   :  { %v460_v47 = vadd.f32 %v459_v46, %v369_v45  ;;  %v1190_v48 = vpop.f32.mrb[7].mxu0 }
 0x353   :  { %1317 = vtanh.f32 %v460_v47 }
 0x354   :  { %v464_v50 = vpop.f32.mrb[8].mxu0 }
 0x355   :  { %v465_v51 = vadd.f32 %v464_v50, %v374_v49  ;;  %v1193_v52 = vpop.f32.mrb[9].mxu0  ;;  %v1091_v50 = vld [vmem:[%s1667_s5 + $0x90] sm:$0xff] }
 0x356   :  { %v1092_v52 = vld [vmem:[%s1667_s5 + $0x98] sm:$0xff] }
 0x357   :  { %1319 = vtanh.f32 %v465_v51 }
 0x359   :  { %v1316_v53 = vpop.eup %1315 }
 0x35d   :  { %v1318_v54 = vpop.eup %1317 }
 0x35e   :  { %v1273_v55 = vpack.c.bf16 %v1318_v54, %v1316_v53  ;;  %v1093_v53 = vld [vmem:[%s1667_s5 + $0xa0] sm:$0xf] }
 0x360   :  { %1274 = vmatpush3.bf16.msra.mxu1 %v1273_v55  ;;  %v836_v55 = vpop.permute.xlu1 %835 }
 0x361   :  { %1198 = vmatprep.subr.mxu1 %v1348_v21  ;;  %v1320_v57 = vpop.eup %1319 }
 0x364   :  { %1199 = vmatpush3.msk.msra.mxu1 %vm148_vm1, %v1320_v57 }
 0x365   :  { %1201 = vmatmul.mubr.msk.f32.vlgmr.msra.gmra.mrb[8].mxu1 %vm138_vm2, %v1061_v56  ;;  %1278 = vmatprep.subr.bf16.mxu1 %v1346_v16 }
 0x366   :  { %1203 = vmatprep.mubr.msk.f32.mxu1 %vm1347_vm0, %v1348_v21 }
 0x369   :  { %1204 = vmatmul.mubr.msk.f32.gmra.mrb[10].mxu1 %vm138_vm2, %v1062_v58  ;;  %v841_v58 = vpop.permute.xlu0 %840 }
 0x36a   :  { %1206 = vmatprep.mubr.msk.f32.mxu1 %vm1347_vm0, %v1348_v21 }
 0x36d   :  { %1207 = vmatmul.mubr.msk.f32.gmra.mrb[12].mxu1 %vm138_vm2, %v1063_v59 }
 0x36e   :  { %1230 = vmatprep.mubr.msk.f32.mxu1 %vm1347_vm0, %v1348_v21 }
 0x438   :  { %v572_v60 = vpop.f32.mrb[8].mxu1 }
 0x439   :  { %v1202_v62 = vpop.f32.mrb[9].mxu1  ;;  %v573_v63 = vadd.f32 %v572_v60, %v482_v61 }
 0x43a   :  { %v846_v62 = vpop.permute.xlu1 %845 }
 0x43b   :  { %1321 = vtanh.f32 %v573_v63 }
 0x43c   :  { %v577_v1 = vpop.f32.mrb[10].mxu1 }
 0x43d   :  { %v578_v2 = vadd.f32 %v577_v1, %v487_v0  ;;  %v1205_v3 = vpop.f32.mrb[11].mxu1 }
 0x43f   :  { %1323 = vtanh.f32 %v578_v2 }
 0x440   :  { %v582_v5 = vpop.f32.mrb[12].mxu1 }
 0x441   :  { %v583_v6 = vadd.f32 %v582_v5, %v492_v4  ;;  %v1208_v7 = vpop.f32.mrb[13].mxu1  ;;  %v943_v5 = vld [vmem:[%s1668_s7] sm:$0x1] }
 0x442   :  { %v950_v7 = vlaneseq }
 0x443   :  { %1325 = vtanh.f32 %v583_v6 }
 0x445   :  { %v1322_v8 = vpop.eup %1321 }
 0x449   :  { %v1324_v9 = vpop.eup %1323 }
 0x44a   :  { %v1276_v10 = vpack.c.bf16 %v1324_v9, %v1322_v8  ;;  %v951_v8 = vshrl.u32 %v950_v7, 7 }
 0x44c   :  { %1277 = vmatpush3.bf16.msra.mxu0 %v1276_v10  ;;  %v952_v9 = vsub.s32 0, %v951_v8  ;;  %v948_v10 = vpop.permute.xlu0 %947 }
 0x44d   :  { %1213 = vmatprep.subr.mxu0 %v1348_v21  ;;  %v1326_v12 = vpop.eup %1325 }
 0x450   :  { %1214 = vmatpush3.msk.msra.mxu0 %vm148_vm1, %v1326_v12 }
 0x451   :  { %1216 = vmatmul.mubr.msk.f32.vlgmr.msra.gmra.mrb[10].mxu0 %vm138_vm2, %v1071_v11  ;;  %1281 = vmatprep.subr.bf16.mxu0 %v1346_v16  ;;  %v953_v11 = vrot.slane %v948_v10, %v952_v9 }
 0x452   :  { %1218 = vmatprep.mubr.msk.f32.mxu0 %vm1347_vm0, %v1348_v21 }
 0x455   :  { %1219 = vmatmul.mubr.msk.f32.gmra.mrb[12].mxu0 %vm138_vm2, %v1072_v13 }
 0x456   :  { %1221 = vmatprep.mubr.msk.f32.mxu0 %vm1347_vm0, %v1348_v21 }
 0x459   :  { %1222 = vmatmul.mubr.msk.f32.gmra.mrb[14].mxu0 %vm138_vm2, %v1073_v14 }
 0x45a   :  { %1245 = vmatprep.mubr.msk.f32.mxu0 %vm1347_vm0, %v1348_v21 }
 0x524   :  { %v690_v15 = vpop.f32.mrb[10].mxu0 }
 0x525   :  { %v1217_v18 = vpop.f32.mrb[11].mxu0  ;;  %v691_v19 = vadd.f32 %v690_v15, %v600_v17 }
 0x527   :  { %1327 = vtanh.f32 %v691_v19 }
 0x528   :  { %v695_v22 = vpop.f32.mrb[12].mxu0 }
 0x529   :  { %v696_v23 = vadd.f32 %v695_v22, %v605_v20  ;;  %v1220_v24 = vpop.f32.mrb[13].mxu0 }
 0x52b   :  { %1329 = vtanh.f32 %v696_v23 }
 0x52c   :  { %v700_v26 = vpop.f32.mrb[14].mxu0 }
 0x52d   :  { %v701_v27 = vadd.f32 %v700_v26, %v610_v25  ;;  %v1223_v28 = vpop.f32.mrb[15].mxu0 }
 0x52f   :  { %1331 = vtanh.f32 %v701_v27 }
 0x531   :  { %v1328_v29 = vpop.eup %1327 }
 0x535   :  { %v1330_v30 = vpop.eup %1329 }
 0x536   :  { %v1279_v31 = vpack.c.bf16 %v1330_v30, %v1328_v29 }
 0x538   :  { %1280 = vmatpush3.bf16.msra.mxu1 %v1279_v31 }
 0x539   :  { %1228 = vmatprep.subr.mxu1 %v1348_v21  ;;  %v1332_v33 = vpop.eup %1331 }
 0x53c   :  { %1229 = vmatpush3.msk.msra.mxu1 %vm148_vm1, %v1332_v33 }
 0x53d   :  { %1231 = vmatmul.mubr.msk.f32.vlgmr.msra.gmra.mrb[14].mxu1 %vm138_vm2, %v1081_v32  ;;  %1284 = vmatprep.subr.bf16.mxu1 %v1346_v16 }
 0x53e   :  { %1233 = vmatprep.mubr.msk.f32.mxu1 %vm1347_vm0, %v1348_v21 }
 0x541   :  { %1234 = vmatmul.mubr.msk.f32.gmra.mrb[16].mxu1 %vm138_vm2, %v1082_v34 }
 0x542   :  { %1236 = vmatprep.mubr.msk.f32.mxu1 %vm1347_vm0, %v1348_v21 }
 0x545   :  { %1237 = vmatmul.mubr.msk.f32.gmra.mrb[18].mxu1 %vm138_vm2, %v1083_v35 }
 0x546   :  { %1260 = vmatprep.mubr.msk.f32.mxu1 %vm1347_vm0, %v1348_v21 }
 0x610   :  { %v808_v16 = vpop.f32.mrb[14].mxu1 }
 0x611   :  { %v1232_v37 = vpop.f32.mrb[15].mxu1  ;;  %v809_v38 = vadd.f32 %v808_v16, %v718_v36 }
 0x613   :  { %1333 = vtanh.f32 %v809_v38 }
 0x614   :  { %v813_v40 = vpop.f32.mrb[16].mxu1 }
 0x615   :  { %v814_v41 = vadd.f32 %v813_v40, %v723_v39  ;;  %v1235_v42 = vpop.f32.mrb[17].mxu1 }
 0x617   :  { %1335 = vtanh.f32 %v814_v41 }
 0x618   :  { %v818_v44 = vpop.f32.mrb[18].mxu1 }
 0x619   :  { %v819_v45 = vadd.f32 %v818_v44, %v728_v43  ;;  %v1238_v46 = vpop.f32.mrb[19].mxu1 }
 0x61b   :  { %1337 = vtanh.f32 %v819_v45 }
 0x61d   :  { %v1334_v47 = vpop.eup %1333 }
 0x621   :  { %v1336_v48 = vpop.eup %1335 }
 0x622   :  { %v1282_v49 = vpack.c.bf16 %v1336_v48, %v1334_v47 }
 0x624   :  { %1283 = vmatpush3.bf16.msra.mxu0 %v1282_v49 }
 0x625   :  { %1243 = vmatprep.subr.mxu0 %v1348_v21  ;;  %v1338_v51 = vpop.eup %1337 }
 0x628   :  { %1244 = vmatpush3.msk.msra.mxu0 %vm148_vm1, %v1338_v51 }
 0x629   :  { %1246 = vmatmul.mubr.msk.f32.vlgmr.msra.gmra.mrb[16].mxu0 %vm138_vm2, %v1091_v50 }
 0x62a   :  { %1248 = vmatprep.mubr.msk.f32.mxu0 %vm1347_vm0, %v1348_v21 }
 0x62d   :  { %1249 = vmatmul.mubr.msk.f32.gmra.mrb[18].mxu0 %vm138_vm2, %v1092_v52 }
 0x62e   :  { %1251 = vmatprep.mubr.msk.f32.mxu0 %vm1347_vm0, %v1348_v21 }
 0x631   :  { %1252 = vmatmul.mubr.msk.f32.gmra.mrb[20].mxu0 %vm138_vm2, %v1093_v53 }
 0x6fc   :  { %v926_v54 = vpop.f32.mrb[16].mxu0 }
 0x6fd   :  { %v1247_v56 = vpop.f32.mrb[17].mxu0  ;;  %v927_v57 = vadd.f32 %v926_v54, %v836_v55 }
 0x6ff   :  { %1339 = vtanh.f32 %v927_v57 }
 0x700   :  { %v931_v59 = vpop.f32.mrb[18].mxu0 }
 0x701   :  { %v932_v60 = vadd.f32 %v931_v59, %v841_v58  ;;  %v1250_v61 = vpop.f32.mrb[19].mxu0 }
 0x703   :  { %1341 = vtanh.f32 %v932_v60 }
 0x704   :  { %v936_v63 = vpop.f32.mrb[20].mxu0 }
 0x705   :  { %v937_v0 = vadd.f32 %v936_v63, %v846_v62  ;;  %v1253_v1 = vpop.f32.mrb[21].mxu0 }
 0x707   :  { %1343 = vtanh.f32 %v937_v0 }
 0x709   :  { %v1340_v2 = vpop.eup %1339 }
 0x70d   :  { %v1342_v3 = vpop.eup %1341 }
 0x70e   :  { %v1285_v4 = vpack.c.bf16 %v1342_v3, %v1340_v2 }
 0x710   :  { %1286 = vmatpush3.bf16.msra.mxu1 %v1285_v4 }
 0x711   :  { %1258 = vmatprep.subr.mxu1 %v1348_v21  ;;  %v1344_v6 = vpop.eup %1343 }
 0x714   :  { %1259 = vmatpush3.msk.msra.mxu1 %vm148_vm1, %v1344_v6 }
 0x715   :  { %1261 = vmatmul.mubr.msk.f32.vlgmr.msra.gmra.mrb[20].mxu1 %vm138_vm2, %v943_v5 }
 0x7e8   :  { %v1026_v12 = vpop.f32.mrb[20].mxu1 }
 0x7e9   :  { %v1027_v13 = vadd.f32 %v1026_v12, %v953_v11  ;;  %v1262_v14 = vpop.f32.mrb[21].mxu1 }
 0x7eb   :  { %1030 = vst [vmem:[%s1669_s9] sm:$0x1] %v1027_v13 }

</bundles_post_ra>
